<compile_context>
chip_gen: v6e
topology: v6e:2x2x1
jax: 0.10.0
libtpu: 0.0.40
codegen_flags: <defaults>
</compile_context>

<pallas_src>
import math

import jax
import jax.numpy as jnp
from jax import lax
from jax.experimental import pallas as pl
from jax.experimental.pallas import tpu as pltpu

# ---------------- config (stands in for CONFIG) ----------------
NUM_CLS = 4
SIZE = (64, 64)
SCALE = 0.25
H = int(SIZE[0] * SCALE)          # 16
W = int(SIZE[1] * SCALE)          # 16
HW = H * W                        # 256
D = int(math.sqrt(H * W) / 2)     # 8
LN_EPS = 1e-5


# ---------------- fused kernel ----------------
def _fused_kernel(feat_ref, p_ref, stats_ref, out_ref):
    """Global avg/max pool + algebraic Linear/LayerNorm/ReLU6 for both heads.

    feat_ref : (block_b, C*H*W) lane-dense feature slab (full feature axis per block,
               so the mean normalizer below is exact; batch rows are independent so
               zero-padded rows only produce discarded garbage).
    p_ref    : (8, HW) f32  rows = [wc*g, bc*g, beta]_avg, [wc*g, bc*g, beta]_max, 0, 0
    stats_ref: (8,)   f32 SMEM  [vw, cwb, vb, 0]_avg, [vw, cwb, vb, 0]_max
    out_ref  : (block_b, 2*HW)  avg head in [:, :HW], max head in [:, HW:]
    """
    x = feat_ref[...].astype(jnp.float32)                    # (tb, CHW), cast in-kernel
    inv_n = 1.0 / float(x.shape[-1])
    avg_s = jnp.sum(x, axis=-1, keepdims=True) * inv_n       # (tb, 1)
    max_s = jnp.max(x, axis=-1, keepdims=True)               # (tb, 1)

    p = p_ref[...]                                           # (8, HW) f32
    hw = out_ref.shape[-1] // 2

    def head(s, a, bg, beta, vw, cwb, vb):
        # var(y) per row from scalar stats (no cross-lane reduction)
        var = (s * s) * vw + (2.0 * s) * cwb + vb            # (tb, 1)
        rstd = lax.rsqrt(var + LN_EPS)                       # EUP, effectively free
        # LN(y)*gamma + beta == (s*wc + bc)*rstd*gamma + beta, gamma pre-folded
        return jnp.clip((s * a + bg) * rstd + beta, 0.0, 6.0)

    out_ref[:, 0:hw] = head(avg_s, p[0:1, :], p[1:2, :], p[2:3, :],
                            stats_ref[0], stats_ref[1], stats_ref[2]
                            ).astype(out_ref.dtype)
    out_ref[:, hw:2 * hw] = head(max_s, p[3:4, :], p[4:5, :], p[5:6, :],
                                 stats_ref[4], stats_ref[5], stats_ref[6]
                                 ).astype(out_ref.dtype)


# ---------------- block-size selection ----------------
def _choose_block_b(B, row_bytes, vmem_budget_bytes=8 << 20):
    """Largest multiple-of-8 row block whose double-buffered in+out fits the budget.

    The 8 MiB budget keeps the double-buffered working set inside every chip's
    default scoped VMEM (v5e 16 MiB, v6e/v7x 32 MiB).  For B >= 16 the block is
    additionally capped at ~B/2 so the grid has >= 2 "parallel" steps and both
    v7x TensorCores get work.
    """
    cap = (vmem_budget_bytes // (2 * row_bytes)) // 8 * 8
    cap = int(max(8, min(cap, 2048)))
    if B < 16:
        return B if B <= cap else cap       # B<=cap: single full-dim block (tile-legal)
    half = max(8, (B // 2) // 8 * 8)
    return int(min(cap, half))


# ---------------- wrapper ----------------
def aggregate_forward(feat, params):
    """feat: NCHW (B, C, H, W).  Returns (avgFeat, maxFeat), each (B, 1, 1, HW)."""
    B, C, Hf, Wf = feat.shape
    hw = Hf * Wf
    assert hw == HW, "params were built for H*W == HW"
    chw = C * Hf * Wf

    # Free contiguous reshape -> lane-dense (B, C*H*W) slab; the feature axis is
    # never tiled, so the in-kernel mean normalizer (1/chw) is exact.
    feat2d = feat.reshape(B, chw)

    row_bytes = chw * feat2d.dtype.itemsize + 2 * hw * 4     # in + out bytes per row
    block_b = _choose_block_b(B, row_bytes)

    grid_b = pl.cdiv(B, block_b)
    b_pad = grid_b * block_b
    if b_pad != B:
        # Rows are independent; padded rows compute (and we discard) garbage.
        feat2d = jnp.pad(feat2d, ((0, b_pad - B), (0, 0)))

    # Explicit scoped-VMEM budget: double-buffered in+out blocks + params + headroom.
    vmem_limit = int(min(48 << 20,
                         max(16 << 20, 2 * block_b * row_bytes + (2 << 20))))

    out = pl.pallas_call(
        _fused_kernel,
        out_shape=jax.ShapeDtypeStruct((b_pad, 2 * hw), jnp.float32),
        grid=(grid_b,),
        in_specs=[
            pl.BlockSpec((block_b, chw), lambda i: (i, 0)),           # lane-dense feat
            pl.BlockSpec((8, hw), lambda i: (0, 0)),                  # exact (8,HW) tile
            pl.BlockSpec(memory_space=pltpu.MemorySpace.SMEM),        # scalar LN stats
        ],
        out_specs=pl.BlockSpec((block_b, 2 * hw), lambda i: (i, 0)),  # single out slab
        compiler_params=pltpu.CompilerParams(
            dimension_semantics=("parallel",),
            vmem_limit_bytes=vmem_limit),
    )(feat2d, params["packed"], params["stats"])

    avg_out = out[:B, :hw].reshape(B, 1, 1, hw)
    max_out = out[:B, hw:].reshape(B, 1, 1, hw)
    return avg_out, max_out


# ---------------- params ----------------
def init_params(key):
    """nn.Linear / nn.LayerNorm-shaped params; packs the kernel-side constants."""
    k1, k2, k3, k4 = jax.random.split(key, 4)
    bound = 1.0 / math.sqrt(D)
    raw = {}
    for name, kw, kb in (("avg", k1, k2), ("max", k3, k4)):
        w = jax.random.uniform(kw, (HW, D), jnp.float32, -bound, bound)  # torch (out,in)
        b = jax.random.uniform(kb, (HW,), jnp.float32, -bound, bound)
        raw[name] = {"w": w, "b": b,
                     "gamma": jnp.ones((HW,), jnp.float32),
                     "beta": jnp.zeros((HW,), jnp.float32)}

    rows, stats = [], []
    for name in ("avg", "max"):
        p = raw[name]
        wsum = p["w"].sum(axis=1)                     # Linear on d identical scalars
        wc = wsum - jnp.mean(wsum)                    # centered (LN mean folded out)
        bc = p["b"] - jnp.mean(p["b"])
        rows += [wc * p["gamma"], bc * p["gamma"], p["beta"]]
        stats += [jnp.mean(wc * wc), jnp.mean(wc * bc), jnp.mean(bc * bc),
                  jnp.float32(0.0)]
    rows += [jnp.zeros((HW,), jnp.float32)] * 2       # pad to exact (8, HW) tile
    packed = jnp.stack(rows).astype(jnp.float32)      # (8, HW)
    stats = jnp.stack(stats).astype(jnp.float32)      # (8,) -> SMEM
    return {"raw": raw, "packed": packed, "stats": stats}


# ---------------- pure-JAX reference for validation ----------------
def _reference(feat, raw):
    B = feat.shape[0]
    x = feat.reshape(B, -1).astype(jnp.float32)
    avg_vec = jnp.broadcast_to(jnp.mean(x, axis=-1, keepdims=True), (B, D))
    max_vec = jnp.broadcast_to(jnp.max(x, axis=-1, keepdims=True), (B, D))

    def head(v, p):
        y = v @ p["w"].T + p["b"]
        mu = jnp.mean(y, axis=-1, keepdims=True)
        var = jnp.mean((y - mu) ** 2, axis=-1, keepdims=True)
        yn = (y - mu) / jnp.sqrt(var + LN_EPS)
        return jnp.clip(yn * p["gamma"] + p["beta"], 0.0, 6.0).reshape(B, 1, 1, HW)

    return head(avg_vec, raw["avg"]), head(max_vec, raw["max"])


if __name__ == "__main__":
    key = jax.random.PRNGKey(0)
    kf, kp = jax.random.split(key)

    # DSConv's Conv2d(1,1,...) implies a single input channel; H >= NUM_CLS.
    feat = jax.random.normal(kf, (2, 1, H, W), jnp.float32)   # (B, 1, 16, 16)
    params = init_params(kp)

    avg_out, max_out = aggregate_forward(feat, params)
    jax.block_until_ready((avg_out, max_out))

    ref_avg, ref_max = _reference(feat, params["raw"])
    assert avg_out.shape == (2, 1, 1, HW) and max_out.shape == (2, 1, 1, HW)
    assert jnp.allclose(avg_out, ref_avg, atol=2e-4, rtol=2e-4)
    assert jnp.allclose(max_out, ref_max, atol=2e-4, rtol=2e-4)

    print("KERNEL_OK")
</pallas_src>

<mosaic_0001>
module attributes {stable_mosaic.version = 11 : i64} {
  func.func @_fused_kernel(%arg0: i32, %arg1: memref<2x256xf32, #tpu.memory_space<vmem>>, %arg2: memref<8x256xf32, #tpu.memory_space<vmem>>, %arg3: memref<8xf32, #tpu.memory_space<smem>>, %arg4: memref<2x512xf32, #tpu.memory_space<vmem>>) attributes {dimension_semantics = [#tpu.dimension_semantics<parallel>], iteration_bounds = array<i64: 1>, scalar_prefetch = 0 : i64, scratch_operands = 0 : i64, tpu.core_type = #tpu.core_type<tc>, window_params = [{transform_indices = @transform_0, window_bounds = array<i64: 2, 256>}, {pipeline_mode = #tpu.pipeline_mode<synchronous>, transform_indices = @transform_1, window_bounds = array<i64: 8, 256>}, {transform_indices = @transform_2, window_bounds = array<i64: 8>}, {transform_indices = @transform_3, window_bounds = array<i64: 2, 512>}]} {
    %c0 = arith.constant 0 : index
    %c0_0 = arith.constant 0 : index
    %0 = vector.load %arg1[%c0, %c0_0] : memref<2x256xf32, #tpu.memory_space<vmem>>, vector<2x256xf32>
    %cst = arith.constant dense<0.000000e+00> : vector<2xf32>
    %1 = vector.multi_reduction <add>, %0, %cst [1] : vector<2x256xf32> to vector<2xf32>
    %2 = vector.shape_cast %1 : vector<2xf32> to vector<2x1xf32>
    %cst_1 = arith.constant 3.906250e-03 : f32
    %3 = vector.broadcast %cst_1 : f32 to vector<2x1xf32>
    %4 = arith.mulf %2, %3 : vector<2x1xf32>
    %cst_2 = arith.constant dense<0xFF800000> : vector<2xf32>
    %5 = vector.multi_reduction <maximumf>, %0, %cst_2 [1] : vector<2x256xf32> to vector<2xf32>
    %6 = vector.shape_cast %5 : vector<2xf32> to vector<2x1xf32>
    %c0_3 = arith.constant 0 : index
    %c0_4 = arith.constant 0 : index
    %7 = vector.load %arg2[%c0_3, %c0_4] : memref<8x256xf32, #tpu.memory_space<vmem>>, vector<8x256xf32>
    %8 = vector.extract_strided_slice %7 {offsets = [0, 0], sizes = [1, 256], strides = [1, 1]} : vector<8x256xf32> to vector<1x256xf32>
    %9 = vector.extract_strided_slice %7 {offsets = [1, 0], sizes = [1, 256], strides = [1, 1]} : vector<8x256xf32> to vector<1x256xf32>
    %10 = vector.extract_strided_slice %7 {offsets = [2, 0], sizes = [1, 256], strides = [1, 1]} : vector<8x256xf32> to vector<1x256xf32>
    %c0_5 = arith.constant 0 : index
    %11 = memref.load %arg3[%c0_5] : memref<8xf32, #tpu.memory_space<smem>>
    %c1 = arith.constant 1 : index
    %12 = memref.load %arg3[%c1] : memref<8xf32, #tpu.memory_space<smem>>
    %c2 = arith.constant 2 : index
    %13 = memref.load %arg3[%c2] : memref<8xf32, #tpu.memory_space<smem>>
    %14 = arith.mulf %4, %4 : vector<2x1xf32>
    %15 = vector.broadcast %11 : f32 to vector<2x1xf32>
    %16 = arith.mulf %14, %15 : vector<2x1xf32>
    %cst_6 = arith.constant 2.000000e+00 : f32
    %17 = vector.broadcast %cst_6 : f32 to vector<2x1xf32>
    %18 = arith.mulf %17, %4 : vector<2x1xf32>
    %19 = vector.broadcast %12 : f32 to vector<2x1xf32>
    %20 = arith.mulf %18, %19 : vector<2x1xf32>
    %21 = arith.addf %16, %20 : vector<2x1xf32>
    %22 = vector.broadcast %13 : f32 to vector<2x1xf32>
    %23 = arith.addf %21, %22 : vector<2x1xf32>
    %cst_7 = arith.constant 9.99999974E-6 : f32
    %24 = vector.broadcast %cst_7 : f32 to vector<2x1xf32>
    %25 = arith.addf %23, %24 : vector<2x1xf32>
    %26 = math.rsqrt %25 : vector<2x1xf32>
    %27 = vector.broadcast %4 : vector<2x1xf32> to vector<2x256xf32>
    %28 = vector.broadcast %8 : vector<1x256xf32> to vector<2x256xf32>
    %29 = arith.mulf %27, %28 : vector<2x256xf32>
    %30 = vector.broadcast %9 : vector<1x256xf32> to vector<2x256xf32>
    %31 = arith.addf %29, %30 : vector<2x256xf32>
    %32 = vector.broadcast %26 : vector<2x1xf32> to vector<2x256xf32>
    %33 = arith.mulf %31, %32 : vector<2x256xf32>
    %34 = vector.broadcast %10 : vector<1x256xf32> to vector<2x256xf32>
    %35 = arith.addf %33, %34 : vector<2x256xf32>
    %cst_8 = arith.constant 0.000000e+00 : f32
    %cst_9 = arith.constant 6.000000e+00 : f32
    %36 = vector.broadcast %cst_8 : f32 to vector<2x256xf32>
    %37 = arith.maximumf %36, %35 : vector<2x256xf32>
    %38 = vector.broadcast %cst_9 : f32 to vector<2x256xf32>
    %39 = arith.minimumf %38, %37 : vector<2x256xf32>
    %c0_10 = arith.constant 0 : index
    %c0_11 = arith.constant 0 : index
    %40 = vector.load %arg4[%c0_10, %c0_11] : memref<2x512xf32, #tpu.memory_space<vmem>>, vector<2x256xf32>
    tpu.vector_store %arg4[%c0_10, %c0_11], %39 {strides = array<i32>} : memref<2x512xf32, #tpu.memory_space<vmem>>, vector<2x256xf32>,
    %41 = vector.extract_strided_slice %7 {offsets = [3, 0], sizes = [1, 256], strides = [1, 1]} : vector<8x256xf32> to vector<1x256xf32>
    %42 = vector.extract_strided_slice %7 {offsets = [4, 0], sizes = [1, 256], strides = [1, 1]} : vector<8x256xf32> to vector<1x256xf32>
    %43 = vector.extract_strided_slice %7 {offsets = [5, 0], sizes = [1, 256], strides = [1, 1]} : vector<8x256xf32> to vector<1x256xf32>
    %c4 = arith.constant 4 : index
    %44 = memref.load %arg3[%c4] : memref<8xf32, #tpu.memory_space<smem>>
    %c5 = arith.constant 5 : index
    %45 = memref.load %arg3[%c5] : memref<8xf32, #tpu.memory_space<smem>>
    %c6 = arith.constant 6 : index
    %46 = memref.load %arg3[%c6] : memref<8xf32, #tpu.memory_space<smem>>
    %47 = arith.mulf %6, %6 : vector<2x1xf32>
    %48 = vector.broadcast %44 : f32 to vector<2x1xf32>
    %49 = arith.mulf %47, %48 : vector<2x1xf32>
    %cst_12 = arith.constant 2.000000e+00 : f32
    %50 = vector.broadcast %cst_12 : f32 to vector<2x1xf32>
    %51 = arith.mulf %50, %6 : vector<2x1xf32>
    %52 = vector.broadcast %45 : f32 to vector<2x1xf32>
    %53 = arith.mulf %51, %52 : vector<2x1xf32>
    %54 = arith.addf %49, %53 : vector<2x1xf32>
    %55 = vector.broadcast %46 : f32 to vector<2x1xf32>
    %56 = arith.addf %54, %55 : vector<2x1xf32>
    %cst_13 = arith.constant 9.99999974E-6 : f32
    %57 = vector.broadcast %cst_13 : f32 to vector<2x1xf32>
    %58 = arith.addf %56, %57 : vector<2x1xf32>
    %59 = math.rsqrt %58 : vector<2x1xf32>
    %60 = vector.broadcast %6 : vector<2x1xf32> to vector<2x256xf32>
    %61 = vector.broadcast %41 : vector<1x256xf32> to vector<2x256xf32>
    %62 = arith.mulf %60, %61 : vector<2x256xf32>
    %63 = vector.broadcast %42 : vector<1x256xf32> to vector<2x256xf32>
    %64 = arith.addf %62, %63 : vector<2x256xf32>
    %65 = vector.broadcast %59 : vector<2x1xf32> to vector<2x256xf32>
    %66 = arith.mulf %64, %65 : vector<2x256xf32>
    %67 = vector.broadcast %43 : vector<1x256xf32> to vector<2x256xf32>
    %68 = arith.addf %66, %67 : vector<2x256xf32>
    %cst_14 = arith.constant 0.000000e+00 : f32
    %cst_15 = arith.constant 6.000000e+00 : f32
    %69 = vector.broadcast %cst_14 : f32 to vector<2x256xf32>
    %70 = arith.maximumf %69, %68 : vector<2x256xf32>
    %71 = vector.broadcast %cst_15 : f32 to vector<2x256xf32>
    %72 = arith.minimumf %71, %70 : vector<2x256xf32>
    %c0_16 = arith.constant 0 : index
    %c256 = arith.constant 256 : index
    %73 = vector.load %arg4[%c0_16, %c256] : memref<2x512xf32, #tpu.memory_space<vmem>>, vector<2x256xf32>
    tpu.vector_store %arg4[%c0_16, %c256], %72 {strides = array<i32>} : memref<2x512xf32, #tpu.memory_space<vmem>>, vector<2x256xf32>,
    return
  }
  func.func @transform_0(%arg0: i32) -> (i32, i32) {
    %c0_i32 = arith.constant 0 : i32
    %c0_i32_0 = arith.constant 0 : i32
    return %arg0, %c0_i32 : i32, i32
  }
  func.func @transform_1(%arg0: i32) -> (i32, i32) {
    %c0_i32 = arith.constant 0 : i32
    %c0_i32_0 = arith.constant 0 : i32
    %c0_i32_1 = arith.constant 0 : i32
    return %c0_i32, %c0_i32_0 : i32, i32
  }
  func.func @transform_2(%arg0: i32) -> i32 {
    %c0_i32 = arith.constant 0 : i32
    %c0_i32_0 = arith.constant 0 : i32
    return %c0_i32 : i32
  }
  func.func @transform_3(%arg0: i32) -> (i32, i32) {
    %c0_i32 = arith.constant 0 : i32
    %c0_i32_0 = arith.constant 0 : i32
    return %arg0, %c0_i32 : i32, i32
  }
}

</mosaic_0001>

<bundles_post_ra>
// kernel: tpu_custom_call.1
= control target key start
LH: loop header
LB: loop body
LE: loop exit
PB: predicated region body
PF: predicated region fallthrough
CT: control target
= control target key end

     0   :  { %8 = vsyncpa [#allocation3], 0  ;;  %s351_s0 = inlined_call_operand.hbm [shape: f32[2,256], index: 0, kind: input, shape index: {}]   ;;  %s352_s1 = inlined_call_operand.hbm [shape: f32[8,256], index: 1, kind: input, shape index: {}]   ;;  %s353_s2 = inlined_call_operand.vmem [shape: f32[8], index: 2, kind: input, shape index: {}]   ;;  %s354_s3 = inlined_call_operand.hbm [shape: f32[2,512], index: 3, kind: output, shape index: {}]  }
   0x1   :  { %9 = vsyncpa [#allocation7], 0 }
   0x2   :  { %10 = vsyncpa [#allocation5], 0 }
   0x3   :  { %11 = vsyncpa [#allocation4], 0  ;;  %s315_s12 = smov [#allocation2]   ;;  %s316_s14 = smov [#allocation6]  }
   0x4   :  { %s18_s13 = sshll.u32 %s315_s12, 4  ;;  %s28_s15 = sshll.u32 %s316_s14, 4  ;;  %s19_s13 = int_to_ptr.vmem [resolvable:$true] %s18_s13  ;;  %s29_s15 = int_to_ptr.vmem [resolvable:$true] %s28_s15 }
   0x5   :  { %s243_s16 = scalar_lea.vmem %s19_s13, 64  ;;  %p248_p1 = scmp.lt.s32.totalorder %s19_s13, %s19_s13 }
   0x6   :  { %p244_p0 = scmp.ne.s32.totalorder %s19_s13, %s243_s16  ;;  %p249_p2 = scmp.lt.s32.totalorder %s243_s16, %s243_s16 }
   0x8   :  { %p250_p3 = por %p249_p2, %p248_p1 }
   0xa   :  { %p251_p4 = pnand %p250_p3, %p244_p0 }
   0xc   :  { %254 = shalt.err (!%p251_p4)
}
   0xd   :  { %21 = dma.hbm_to_vmem [thread:$0]  %s351_s0, 64, %s19_s13, [#allocation3]  }
   0xe   :  { %s263_s19 = scalar_lea.vmem %s29_s15, 256  ;;  %p268_p6 = scmp.lt.s32.totalorder %s29_s15, %s29_s15 }
   0xf   :  { %p264_p5 = scmp.ne.s32.totalorder %s29_s15, %s263_s19  ;;  %p269_p7 = scmp.lt.s32.totalorder %s263_s19, %s263_s19 }
  0x11   :  { %p270_p8 = por %p269_p7, %p268_p6 }
  0x13   :  { %p271_p9 = pnand %p270_p8, %p264_p5 }
  0x15   :  { %274 = shalt.err (!%p271_p9)
}
  0x16   :  { %31 = dma.hbm_to_vmem [thread:$0]  %s352_s1, 256, %s29_s15, [#allocation7]  }
  0x17   :  { %s38_s24 = sshll.u32 %s353_s2, 4  ;;  %s39_s24 = int_to_ptr.vmem [resolvable:$true] %s38_s24 }
  0x18   :  { %s275_s25 = scalar_lea.vmem %s39_s24, 16  ;;  %p280_p11 = scmp.lt.s32.totalorder %s39_s24, %s39_s24 }
  0x19   :  { %p276_p10 = scmp.ne.s32.totalorder %s39_s24, %s275_s25  ;;  %p281_p12 = scmp.lt.s32.totalorder %s275_s25, %s275_s25 }
  0x1b   :  { %p282_p13 = por %p281_p12, %p280_p11 }
  0x1d   :  { %p283_p0 = pnand %p282_p13, %p276_p10 }
  0x1f   :  { %286 = shalt.err (!%p283_p0)
}
  0x20   :  { %s317_s0 = smov [#allocation8]  }
  0x21   :  { %41 = dma.vmem_to_smem %s39_s24, 16, %s317_s0, [#allocation5]  }
  0x22   :  { %307 = dma.done.wait [#allocation3], 64  }
  0x23   :  { %308 = vsyncadd [#allocation3], 4294967232 }
  0x24   :  { %309 = dma.done.wait [#allocation7], 256  }
  0x25   :  { %310 = vsyncadd [#allocation7], 4294967040 }
  0x26   :  { %311 = dma.done.wait [#allocation5], 16  }
  0x27   :  { %312 = vsyncadd [#allocation5], 4294967280 }
  0x28   :  { %51 = sfence }
  0x29   :  { %v219_v0 = vld.sshfl [vmem:[#allocation2] sm:$0x33 pattern:$0x76325410]  ;;  %vm64_vm0 = vcmask 1041408   ;;  %s78_s1 = sld [smem:[#allocation8]]  ;;  %v92_v14 = vlaneseq }
  0x2a   :  { %v61_v1 = vcombine.high %v219_v0, %v219_v0  ;;  %v65_v2 = vsel %vm64_vm0, %v219_v0, 0.0  ;;  %v71_v4 = vsel %vm64_vm0, %v219_v0, -inf  ;;  %s220_s2 = sld [smem:[#allocation8 + $0x1]]  ;;  %v76_v34 = vld [vmem:[#allocation6] sm:$0xff]  ;;  %v77_v35 = vld [vmem:[#allocation6 + $0x8] sm:$0xff]  ;;  %s318_s30 = smov [#allocation9]  }
  0x2b   :  { %s223_s26 = sld [smem:[#allocation8 + $0x4]]  ;;  %v93_v27 = vshrl.u32 %v92_v14, 7  ;;  %s208_s4 = sshll.u32 %s318_s30, 4  ;;  %s209_s4 = int_to_ptr.vmem [resolvable:$true] %s208_s4 }
  0x2c   :  { %v66_v3 = vsel %vm64_vm0, %v61_v1, 0.0  ;;  %v72_v5 = vsel %vm64_vm0, %v61_v1, -inf  ;;  %s224_s27 = sld [smem:[#allocation8 + $0x5]]  ;;  %s287_s5 = scalar_lea.vmem %s209_s4, 128 }
  0x2d   :  { %v67_v6 = vadd.f32 %v66_v3, %v65_v2  ;;  %v73_v7 = vmax.f32 %v71_v4, %v72_v5  ;;  %s221_s28 = sld [smem:[#allocation8 + $0x2]]  ;;  %v94_v32 = vsub.s32 0, %v93_v27  ;;  %v156_v36 = vsub.s32 3, %v93_v27  ;;  %p288_p1 = scmp.ne.s32.totalorder %s209_s4, %s287_s5 }
  0x2e   :  { %s225_s29 = sld [smem:[#allocation8 + $0x6]]  ;;  %v104_v37 = vsub.s32 1, %v93_v27  ;;  %v166_v42 = vsub.s32 4, %v93_v27  ;;  %v116_v47 = vsub.s32 2, %v93_v27  ;;  %v178_v48 = vsub.s32 5, %v93_v27  ;;  %p292_p2 = scmp.lt.s32.totalorder %s209_s4, %s209_s4 }
  0x2f   :  { %68 = vadd.xlane.f32.xlu0 %v67_v6  ;;  %v82_v10 = vstv %s78_s1  ;;  %v95_v38 = vrot.slane %v76_v34, %v94_v32  ;;  %v99_v39 = vrot.slane %v77_v35, %v94_v32  ;;  %v157_v40 = vrot.slane %v76_v34, %v156_v36  ;;  %p293_p3 = scmp.lt.s32.totalorder %s287_s5, %s287_s5 }
  0x30   :  { %v85_v11 = vstv %s220_s2  ;;  %v161_v41 = vrot.slane %v77_v35, %v156_v36  ;;  %v105_v43 = vrot.slane %v76_v34, %v104_v37  ;;  %v109_v46 = vrot.slane %v77_v35, %v104_v37 }
  0x31   :  { %v144_v15 = vstv %s223_s26  ;;  %v167_v49 = vrot.slane %v76_v34, %v166_v42  ;;  %v171_v50 = vrot.slane %v77_v35, %v166_v42  ;;  %v117_v55 = vrot.slane %v76_v34, %v116_v47  ;;  %p294_p4 = por %p293_p3, %p292_p2 }
  0x32   :  { %v147_v16 = vstv %s224_s27  ;;  %v121_v56 = vrot.slane %v77_v35, %v116_v47  ;;  %v179_v58 = vrot.slane %v76_v34, %v178_v48  ;;  %v183_v59 = vrot.slane %v77_v35, %v178_v48 }
  0x33   :  { %74 = vmax.xlane.f32.xlu0 %v73_v7  ;;  %v88_v22 = vstv %s221_s28  ;;  %p295_p5 = pnand %p294_p4, %p288_p1 }
  0x34   :  { %v150_v26 = vstv %s225_s29 }
  0xb8   :  { %v69_v8 = vpop.xlane.xlu0 %68 }
  0xb9   :  { %v70_v9 = vmul.f32 0.00390625, %v69_v8 }
  0xbb   :  { %v81_v12 = vmul.f32 %v70_v9, %v70_v9  ;;  %v84_v13 = vmul.f32 2.0, %v70_v9  ;;  %v100_v44 = vmul.f32 %v95_v38, %v70_v9  ;;  %v101_v45 = vmul.f32 %v99_v39, %v70_v9 }
  0xbc   :  { %v75_v17 = vpop.xlane.xlu0 %74 }
  0xbd   :  { %v83_v18 = vmul.f32 %v82_v10, %v81_v12  ;;  %v86_v19 = vmul.f32 %v85_v11, %v84_v13  ;;  %v143_v20 = vmul.f32 %v75_v17, %v75_v17  ;;  %v146_v21 = vmul.f32 2.0, %v75_v17 }
  0xbe   :  { %v162_v51 = vmul.f32 %v157_v40, %v75_v17  ;;  %v163_v52 = vmul.f32 %v161_v41, %v75_v17  ;;  %v110_v53 = vadd.f32 %v105_v43, %v100_v44  ;;  %v111_v54 = vadd.f32 %v109_v46, %v101_v45 }
  0xbf   :  { %v87_v23 = vadd.f32 %v86_v19, %v83_v18  ;;  %v145_v24 = vmul.f32 %v144_v15, %v143_v20  ;;  %v148_v25 = vmul.f32 %v147_v16, %v146_v21 }
  0xc0   :  { %v172_v60 = vadd.f32 %v167_v49, %v162_v51  ;;  %v173_v61 = vadd.f32 %v171_v50, %v163_v52 }
  0xc1   :  { %v89_v28 = vadd.f32 %v88_v22, %v87_v23  ;;  %v149_v29 = vadd.f32 %v148_v25, %v145_v24 }
  0xc3   :  { %v90_v30 = vadd.f32 1e-05, %v89_v28  ;;  %v151_v31 = vadd.f32 %v150_v26, %v149_v29 }
  0xc5   :  { %231 = vrsqrt.f32 %v90_v30  ;;  %v152_v33 = vadd.f32 1e-05, %v151_v31 }
  0xc7   :  { %233 = vrsqrt.f32 %v152_v33 }
  0xd2   :  { %v232_v57 = vpop.eup %231 }
  0xd3   :  { %v112_v62 = vmul.f32 %v232_v57, %v110_v53  ;;  %v113_v63 = vmul.f32 %v232_v57, %v111_v54 }
  0xd4   :  { %v234_v0 = vpop.eup %233 }
  0xd5   :  { %v122_v1 = vadd.f32 %v117_v55, %v112_v62  ;;  %v123_v2 = vadd.f32 %v121_v56, %v113_v63  ;;  %v174_v3 = vmul.f32 %v234_v0, %v172_v60  ;;  %v175_v4 = vmul.f32 %v234_v0, %v173_v61 }
  0xd7   :  { %v124_v5 = vmax.f32 %v122_v1, 0.0  ;;  %v125_v6 = vmax.f32 %v123_v2, 0.0  ;;  %v184_v7 = vadd.f32 %v179_v58, %v174_v3  ;;  %v185_v8 = vadd.f32 %v183_v59, %v175_v4 }
  0xd9   :  { %v126_v9 = vmin.f32 %v124_v5, 6.0  ;;  %v127_v10 = vmin.f32 %v125_v6, 6.0  ;;  %v186_v11 = vmax.f32 %v184_v7, 0.0  ;;  %v187_v12 = vmax.f32 %v185_v8, 0.0 }
  0xdb   :  { %v130_v13 = vcombine.low %v126_v9, %v127_v10  ;;  %v188_v14 = vmin.f32 %v186_v11, 6.0  ;;  %v189_v15 = vmin.f32 %v187_v12, 6.0 }
  0xdd   :  { %222 = vst.sshfl [vmem:[#allocation9] sm:$0x33 pattern:$0x76325410] %v130_v13  ;;  %v192_v16 = vcombine.low %v188_v14, %v189_v15 }
  0xdf   :  { %226 = vst.sshfl [vmem:[#allocation9 + $0x4] sm:$0x33 pattern:$0x76325410] %v192_v16 }
  0xe0   :  { %298 = shalt.err (!%p295_p5)
}
  0xe1   :  { %211 = dma.vmem_to_hbm [thread:$0]  %s209_s4, 128, %s354_s3, [#allocation4]  }
  0xe2   :  { %313 = dma.done.wait [#allocation4], 128  }
  0xe3   :  { %314 = vsyncadd [#allocation4], 4294967168 }
  0xe4   :  { %215 = vsyncpa [#allocation3], 1 }
  0xe5   :  { %216 = vsyncpa [#allocation7], 1 }
  0xe6   :  { %217 = vsyncpa [#allocation4], 1 }
  0xe7   :  { %218 = vsyncpa [#allocation5], 1 }

</bundles_post_ra>
